<compile_context>
chip_gen: v6e
topology: v6e:2x2x1
jax: 0.10.0
libtpu: 0.0.40
codegen_flags: <defaults>
</compile_context>

<pallas_src>
import jax
import jax.numpy as jnp
from jax.experimental import pallas as pl
from jax.experimental.pallas import tpu as pltpu


def _round_up(x, m):
    return ((x + m - 1) // m) * m


def qnet_kernel(x_ref, w1_ref, b1_ref, w2_ref, b2_ref, w3_ref, b3_ref, o_ref):
    # x_ref: (6, TILE_B) bf16   weights: (out, in) bf16   biases: (out, 1) f32
    x = x_ref[...]
    # fc1 + relu  -> (64, TILE_B) f32
    h1 = jnp.dot(w1_ref[...], x, preferred_element_type=jnp.float32)
    h1 = jnp.maximum(h1 + b1_ref[...], 0.0)
    # fc2 + relu  -> (64, TILE_B) f32
    h2 = jnp.dot(w2_ref[...], h1.astype(jnp.bfloat16),
                 preferred_element_type=jnp.float32)
    h2 = jnp.maximum(h2 + b2_ref[...], 0.0)
    # fc3 (no activation) -> (4, TILE_B) f32
    out = jnp.dot(w3_ref[...], h2.astype(jnp.bfloat16),
                  preferred_element_type=jnp.float32)
    o_ref[...] = (out + b3_ref[...]).astype(o_ref.dtype)


def qnet_forward(x, params, *, tile_b=512):
    """x: (B, 6) float32 -> (B, 4) float32"""
    w1, b1, w2, b2, w3, b3 = params
    B = x.shape[0]
    d_in, n1, n2, d_out = w1.shape[1], w1.shape[0], w2.shape[0], w3.shape[0]

    # lane-aligned batch tile; shrink for small batches, pad B to a tile multiple
    tile_b = _round_up(tile_b, 128)
    tile_b = min(tile_b, _round_up(B, 128))
    b_pad = _round_up(B, tile_b)

    # feature-major (batch-in-lanes) layout; bf16 streaming/weight operands
    x_t = jnp.pad(x.T.astype(jnp.bfloat16), ((0, 0), (0, b_pad - B)))
    w1b = w1.astype(jnp.bfloat16)
    w2b = w2.astype(jnp.bfloat16)
    w3b = w3.astype(jnp.bfloat16)

    const = lambda i: (0, 0)  # weights/biases resident across all batch tiles

    out = pl.pallas_call(
        qnet_kernel,
        out_shape=jax.ShapeDtypeStruct((d_out, b_pad), jnp.float32),
        grid=(b_pad // tile_b,),
        in_specs=[
            pl.BlockSpec((d_in, tile_b), lambda i: (0, i)),
            pl.BlockSpec((n1, d_in), const),
            pl.BlockSpec((n1, 1), const),
            pl.BlockSpec((n2, n1), const),
            pl.BlockSpec((n2, 1), const),
            pl.BlockSpec((d_out, n2), const),
            pl.BlockSpec((d_out, 1), const),
        ],
        out_specs=pl.BlockSpec((d_out, tile_b), lambda i: (0, i)),
        compiler_params=pltpu.CompilerParams(
            dimension_semantics=("parallel",),
        ),
    )(x_t, w1b, b1, w2b, b2, w3b, b3)

    return out[:, :B].T


def init_params(key):
    """Deterministic init mimicking nn.Linear default (uniform +/- 1/sqrt(fan_in)).
    Weights stored PyTorch-style as (out_features, in_features); biases (out, 1)."""
    def linear(key, fan_in, fan_out):
        kw, kb = jax.random.split(key)
        bound = 1.0 / (fan_in ** 0.5)
        w = jax.random.uniform(kw, (fan_out, fan_in), jnp.float32, -bound, bound)
        b = jax.random.uniform(kb, (fan_out, 1), jnp.float32, -bound, bound)
        return w, b

    k1, k2, k3 = jax.random.split(key, 3)
    w1, b1 = linear(k1, 6, 64)
    w2, b2 = linear(k2, 64, 64)
    w3, b3 = linear(k3, 64, 4)
    return (w1, b1, w2, b2, w3, b3)


def qnet_reference(x, params):
    """Pure-JAX f32 reference for correctness check."""
    w1, b1, w2, b2, w3, b3 = params
    h = jnp.maximum(x @ w1.T + b1.T, 0.0)
    h = jnp.maximum(h @ w2.T + b2.T, 0.0)
    return h @ w3.T + b3.T


# TODO(synk): sample_action (epsilon-greedy over argmax) is host-side control flow;
# the caller should do jnp.argmax(qnet_forward(obs, params)) + its own RNG coin flip.


if __name__ == "__main__":
    key = jax.random.PRNGKey(0)
    kx, kp = jax.random.split(key)

    B = 2  # small batch of observations, each with 6 features
    x = jax.random.normal(kx, (B, 6), jnp.float32)
    params = init_params(kp)

    out = jax.block_until_ready(qnet_forward(x, params))
    ref = qnet_reference(x, params)

    assert out.shape == (B, 4), out.shape
    # bf16 inputs/weights with f32 accumulation: compare against f32 reference at
    # a tolerance consistent with bf16 rounding of O(1) activations.
    assert jnp.allclose(out, ref, atol=5e-2, rtol=5e-2), "mismatch vs reference"

    print("KERNEL_OK")
</pallas_src>

<mosaic_0001>
module attributes {stable_mosaic.version = 11 : i64} {
  func.func @qnet_kernel(%arg0: i32, %arg1: memref<6x128xbf16, #tpu.memory_space<vmem>>, %arg2: memref<64x6xbf16, #tpu.memory_space<vmem>>, %arg3: memref<64x1xf32, #tpu.memory_space<vmem>>, %arg4: memref<64x64xbf16, #tpu.memory_space<vmem>>, %arg5: memref<64x1xf32, #tpu.memory_space<vmem>>, %arg6: memref<4x64xbf16, #tpu.memory_space<vmem>>, %arg7: memref<4x1xf32, #tpu.memory_space<vmem>>, %arg8: memref<4x128xf32, #tpu.memory_space<vmem>>) attributes {dimension_semantics = [#tpu.dimension_semantics<parallel>], iteration_bounds = array<i64: 1>, scalar_prefetch = 0 : i64, scratch_operands = 0 : i64, tpu.core_type = #tpu.core_type<tc>, window_params = [{transform_indices = @transform_0, window_bounds = array<i64: 6, 128>}, {pipeline_mode = #tpu.pipeline_mode<synchronous>, transform_indices = @transform_1, window_bounds = array<i64: 64, 6>}, {pipeline_mode = #tpu.pipeline_mode<synchronous>, transform_indices = @transform_2, window_bounds = array<i64: 64, 1>}, {pipeline_mode = #tpu.pipeline_mode<synchronous>, transform_indices = @transform_3, window_bounds = array<i64: 64, 64>}, {pipeline_mode = #tpu.pipeline_mode<synchronous>, transform_indices = @transform_4, window_bounds = array<i64: 64, 1>}, {pipeline_mode = #tpu.pipeline_mode<synchronous>, transform_indices = @transform_5, window_bounds = array<i64: 4, 64>}, {pipeline_mode = #tpu.pipeline_mode<synchronous>, transform_indices = @transform_6, window_bounds = array<i64: 4, 1>}, {transform_indices = @transform_7, window_bounds = array<i64: 4, 128>}]} {
    %c0 = arith.constant 0 : index
    %c0_0 = arith.constant 0 : index
    %0 = vector.load %arg1[%c0, %c0_0] : memref<6x128xbf16, #tpu.memory_space<vmem>>, vector<6x128xbf16>
    %c0_1 = arith.constant 0 : index
    %c0_2 = arith.constant 0 : index
    %1 = vector.load %arg2[%c0_1, %c0_2] : memref<64x6xbf16, #tpu.memory_space<vmem>>, vector<64x6xbf16>
    %cst = arith.constant dense<0.000000e+00> : vector<64x128xf32>
    %2 = tpu.matmul %1, %0, %cst {dimension_numbers = #tpu.dot_dimension_numbers<[1], [0], [0], [1], [0, 0, 1, 1], [], []>} : vector<64x6xbf16>, vector<6x128xbf16>, vector<64x128xf32> -> vector<64x128xf32>
    %c0_3 = arith.constant 0 : index
    %c0_4 = arith.constant 0 : index
    %3 = vector.load %arg3[%c0_3, %c0_4] : memref<64x1xf32, #tpu.memory_space<vmem>>, vector<64x1xf32>
    %4 = vector.broadcast %3 : vector<64x1xf32> to vector<64x128xf32>
    %5 = arith.addf %2, %4 : vector<64x128xf32>
    %cst_5 = arith.constant 0.000000e+00 : f32
    %6 = vector.broadcast %cst_5 : f32 to vector<64x128xf32>
    %7 = arith.maximumf %5, %6 : vector<64x128xf32>
    %c0_6 = arith.constant 0 : index
    %c0_7 = arith.constant 0 : index
    %8 = vector.load %arg4[%c0_6, %c0_7] : memref<64x64xbf16, #tpu.memory_space<vmem>>, vector<64x64xbf16>
    %9 = arith.truncf %7 : vector<64x128xf32> to vector<64x128xbf16>
    %cst_8 = arith.constant dense<0.000000e+00> : vector<64x128xf32>
    %10 = tpu.matmul %8, %9, %cst_8 {dimension_numbers = #tpu.dot_dimension_numbers<[1], [0], [0], [1], [0, 0, 1, 1], [], []>} : vector<64x64xbf16>, vector<64x128xbf16>, vector<64x128xf32> -> vector<64x128xf32>
    %c0_9 = arith.constant 0 : index
    %c0_10 = arith.constant 0 : index
    %11 = vector.load %arg5[%c0_9, %c0_10] : memref<64x1xf32, #tpu.memory_space<vmem>>, vector<64x1xf32>
    %12 = vector.broadcast %11 : vector<64x1xf32> to vector<64x128xf32>
    %13 = arith.addf %10, %12 : vector<64x128xf32>
    %cst_11 = arith.constant 0.000000e+00 : f32
    %14 = vector.broadcast %cst_11 : f32 to vector<64x128xf32>
    %15 = arith.maximumf %13, %14 : vector<64x128xf32>
    %c0_12 = arith.constant 0 : index
    %c0_13 = arith.constant 0 : index
    %16 = vector.load %arg6[%c0_12, %c0_13] : memref<4x64xbf16, #tpu.memory_space<vmem>>, vector<4x64xbf16>
    %17 = arith.truncf %15 : vector<64x128xf32> to vector<64x128xbf16>
    %cst_14 = arith.constant dense<0.000000e+00> : vector<4x128xf32>
    %18 = tpu.matmul %16, %17, %cst_14 {dimension_numbers = #tpu.dot_dimension_numbers<[1], [0], [0], [1], [0, 0, 1, 1], [], []>} : vector<4x64xbf16>, vector<64x128xbf16>, vector<4x128xf32> -> vector<4x128xf32>
    %c0_15 = arith.constant 0 : index
    %c0_16 = arith.constant 0 : index
    %19 = vector.load %arg7[%c0_15, %c0_16] : memref<4x1xf32, #tpu.memory_space<vmem>>, vector<4x1xf32>
    %20 = vector.broadcast %19 : vector<4x1xf32> to vector<4x128xf32>
    %21 = arith.addf %18, %20 : vector<4x128xf32>
    %c0_17 = arith.constant 0 : index
    %c0_18 = arith.constant 0 : index
    %22 = vector.load %arg8[%c0_17, %c0_18] : memref<4x128xf32, #tpu.memory_space<vmem>>, vector<4x128xf32>
    tpu.vector_store %arg8[%c0_17, %c0_18], %21 {strides = array<i32>} : memref<4x128xf32, #tpu.memory_space<vmem>>, vector<4x128xf32>,
    return
  }
  func.func @transform_0(%arg0: i32) -> (i32, i32) {
    %c0_i32 = arith.constant 0 : i32
    %c0_i32_0 = arith.constant 0 : i32
    return %c0_i32, %arg0 : i32, i32
  }
  func.func @transform_1(%arg0: i32) -> (i32, i32) {
    %c0_i32 = arith.constant 0 : i32
    %c0_i32_0 = arith.constant 0 : i32
    %c0_i32_1 = arith.constant 0 : i32
    return %c0_i32, %c0_i32_0 : i32, i32
  }
  func.func @transform_2(%arg0: i32) -> (i32, i32) {
    %c0_i32 = arith.constant 0 : i32
    %c0_i32_0 = arith.constant 0 : i32
    %c0_i32_1 = arith.constant 0 : i32
    return %c0_i32, %c0_i32_0 : i32, i32
  }
  func.func @transform_3(%arg0: i32) -> (i32, i32) {
    %c0_i32 = arith.constant 0 : i32
    %c0_i32_0 = arith.constant 0 : i32
    %c0_i32_1 = arith.constant 0 : i32
    return %c0_i32, %c0_i32_0 : i32, i32
  }
  func.func @transform_4(%arg0: i32) -> (i32, i32) {
    %c0_i32 = arith.constant 0 : i32
    %c0_i32_0 = arith.constant 0 : i32
    %c0_i32_1 = arith.constant 0 : i32
    return %c0_i32, %c0_i32_0 : i32, i32
  }
  func.func @transform_5(%arg0: i32) -> (i32, i32) {
    %c0_i32 = arith.constant 0 : i32
    %c0_i32_0 = arith.constant 0 : i32
    %c0_i32_1 = arith.constant 0 : i32
    return %c0_i32, %c0_i32_0 : i32, i32
  }
  func.func @transform_6(%arg0: i32) -> (i32, i32) {
    %c0_i32 = arith.constant 0 : i32
    %c0_i32_0 = arith.constant 0 : i32
    %c0_i32_1 = arith.constant 0 : i32
    return %c0_i32, %c0_i32_0 : i32, i32
  }
  func.func @transform_7(%arg0: i32) -> (i32, i32) {
    %c0_i32 = arith.constant 0 : i32
    %c0_i32_0 = arith.constant 0 : i32
    return %c0_i32, %arg0 : i32, i32
  }
}

</mosaic_0001>

<bundles_post_ra>
// kernel: tpu_custom_call.1
= control target key start
LH: loop header
LB: loop body
LE: loop exit
PB: predicated region body
PF: predicated region fallthrough
CT: control target
= control target key end

     0   :  { %vm118_vm0 = vcmask 1042432   ;;  %vm105_vm1 = vcmask 48128   ;;  %v540_v5 = vmov 0   ;;  %s677_s0 = inlined_call_operand.vmem [shape: bf16[6,128], index: 0, kind: input, shape index: {}]   ;;  %s678_s1 = inlined_call_operand.vmem [shape: bf16[64,6], index: 1, kind: input, shape index: {}]   ;;  %s679_s2 = inlined_call_operand.vmem [shape: f32[64,1], index: 2, kind: input, shape index: {}]   ;;  %s680_s3 = inlined_call_operand.vmem [shape: bf16[64,64], index: 3, kind: input, shape index: {}]   ;;  %s681_s4 = inlined_call_operand.vmem [shape: f32[64,1], index: 4, kind: input, shape index: {}]   ;;  %s682_s5 = inlined_call_operand.vmem [shape: bf16[4,64], index: 5, kind: input, shape index: {}]   ;;  %s683_s6 = inlined_call_operand.vmem [shape: f32[4,1], index: 6, kind: input, shape index: {}]   ;;  %s684_s7 = inlined_call_operand.hbm [shape: f32[4,128], index: 7, kind: output, shape index: {}]  }
   0x1   :  { %v28_v0 = vld [vmem:[%s677_s0] sm:$0x7]  ;;  %v511_v3 = vld [vmem:[%s678_s1 + $0x8] sm:$0xff]   ;;  %v512_v4 = vld [vmem:[%s678_s1 + $0x10] sm:$0xff]   ;;  %508 = vset.pattern.permute.xlu0 %v540_v5  ;;  %509 = vset.pattern.permute.xlu1 %v540_v5 }
   0x2   :  { %v510_v1 = vld [vmem:[%s678_s1] sm:$0xff]   ;;  %503 = vmatprep.subr.msk.bf16.mxu0 %vm118_vm0, %v28_v0  ;;  %v120_v2 = vsel %vm118_vm0, %v28_v0, 0  ;;  %v43_v6 = vld [vmem:[%s679_s2 + $0x30] sm:$0xff]  ;;  %v44_v8 = vld [vmem:[%s679_s2 + $0x38] sm:$0xff] }
   0x3   :  { %466 = vmatpush3.bf16.msra.mxu0 %v120_v2  ;;  %467 = vmatprep.mubr.msk.bf16.mxu0 %vm105_vm1, %v510_v1  ;;  %v41_v7 = vld [vmem:[%s679_s2 + $0x20] sm:$0xff]  ;;  %v42_v9 = vld [vmem:[%s679_s2 + $0x28] sm:$0xff]  ;;  %v513_v10 = vld [vmem:[%s678_s1 + $0x18] sm:$0xff]  }
   0x4   :  { %77 = vperm.xlu0 %508, %v43_v6   ;;  %67 = vperm.xlu1 %509, %v41_v7   ;;  %v39_v11 = vld [vmem:[%s679_s2 + $0x10] sm:$0xff]  ;;  %v40_v12 = vld [vmem:[%s679_s2 + $0x18] sm:$0xff] }
   0x6   :  { %468 = vmatmul.mubr.msk.bf16.vlgmr.msra.gmra.mxu0 %vm105_vm1, %v511_v3 }
   0x7   :  { %471 = vmatprep.mubr.msk.bf16.mxu0 %vm105_vm1, %v512_v4 }
   0x8   :  { %82 = vperm.xlu0 %508, %v44_v8   ;;  %72 = vperm.xlu1 %509, %v42_v9  }
   0xc   :  { %57 = vperm.xlu0 %508, %v39_v11  }
   0xe   :  { %472 = vmatmul.mubr.msk.bf16.gmra.mxu0 %vm105_vm1, %v513_v10 }
   0xf   :  { %12 = vsyncpa [#allocation3], 0  ;;  %v37_v13 = vld [vmem:[%s679_s2] sm:$0xff]  ;;  %62 = vperm.xlu1 %509, %v40_v12   ;;  %v38_v14 = vld [vmem:[%s679_s2 + $0x8] sm:$0xff]  ;;  %vm275_vm2 = vcmask 523264   ;;  %v541_v0 = vmov 0.0  }
  0x10   :  { %47 = vperm.xlu0 %508, %v37_v13   ;;  %v213_v15 = vld [vmem:[%s681_s4 + $0x30] sm:$0xff]  ;;  %v214_v16 = vld [vmem:[%s681_s4 + $0x38] sm:$0xff]  ;;  %v211_v17 = vld [vmem:[%s681_s4 + $0x20] sm:$0xff]  ;;  %491 = vmatprep.subr.bf16.mxu0 %v541_v0  ;;  %vm542_vm3 = vmmov 0   ;;  %s543_s24 = smov [#allocation2]  }
  0x11   :  { %v212_v18 = vld [vmem:[%s681_s4 + $0x28] sm:$0xff]  ;;  %v209_v19 = vld [vmem:[%s681_s4 + $0x10] sm:$0xff]  ;;  %v210_v20 = vld [vmem:[%s681_s4 + $0x18] sm:$0xff]  ;;  %499 = vmatprep.mubr.msk.bf16.mxu0 %vm542_vm3, %v541_v0  ;;  %s422_s25 = sshll.u32 %s543_s24, 4  ;;  %s423_s25 = int_to_ptr.vmem [resolvable:$true] %s422_s25 }
  0x12   :  { %v207_v21 = vld [vmem:[%s681_s4] sm:$0xff]  ;;  %v208_v22 = vld [vmem:[%s681_s4 + $0x8] sm:$0xff]  ;;  %v516_v62 = vld [vmem:[%s680_s3 + $0x10] sm:$0xff]   ;;  %s518_s26 = scalar_lea.vmem %s423_s25, 64  ;;  %p523_p1 = scmp.lt.s32.totalorder %s423_s25, %s423_s25 }
  0x13   :  { %52 = vperm.xlu1 %509, %v38_v14   ;;  %v366_v23 = vld [vmem:[%s683_s6] sm:$0xf]  ;;  %v515_v61 = vld [vmem:[%s680_s3 + $0x8] sm:$0xff]   ;;  %v517_v63 = vld [vmem:[%s680_s3 + $0x18] sm:$0xff]   ;;  %p519_p0 = scmp.ne.s32.totalorder %s423_s25, %s518_s26  ;;  %p524_p2 = scmp.lt.s32.totalorder %s518_s26, %s518_s26 }
  0x14   :  { %247 = vperm.xlu0 %508, %v213_v15   ;;  %v514_v24 = vld [vmem:[%s680_s3] sm:$0xff]  }
  0x15   :  { %483 = vmatprep.mubr.msk.bf16.mxu1 %vm275_vm2, %v514_v24  ;;  %p525_p3 = por %p524_p2, %p523_p1 }
  0x17   :  { %252 = vperm.xlu1 %509, %v214_v16   ;;  %p526_p4 = pnand %p525_p3, %p519_p0 }
  0x18   :  { %237 = vperm.xlu0 %508, %v211_v17  }
  0x1b   :  { %242 = vperm.xlu1 %509, %v212_v18  }
  0x1c   :  { %227 = vperm.xlu0 %508, %v209_v19  }
  0x1f   :  { %232 = vperm.xlu1 %509, %v210_v20  }
  0x20   :  { %217 = vperm.xlu0 %508, %v207_v21  }
  0x23   :  { %222 = vperm.xlu1 %509, %v208_v22  }
  0x24   :  { %369 = vperm.xlu0 %508, %v366_v23  }
  0x7f   :  { %v68_v25 = vpop.permute.xlu1 %67  ;;  %v78_v27 = vpop.permute.xlu0 %77 }
  0x83   :  { %v73_v30 = vpop.permute.xlu1 %72  ;;  %v83_v32 = vpop.permute.xlu0 %82 }
  0x87   :  { %v58_v40 = vpop.permute.xlu0 %57 }
  0x8a   :  { %v63_v36 = vpop.permute.xlu1 %62 }
  0x8b   :  { %v48_v54 = vpop.permute.xlu0 %47 }
  0x8e   :  { %v53_v50 = vpop.permute.xlu1 %52 }
  0x8f   :  { %v248_v4 = vpop.permute.xlu0 %247 }
  0x92   :  { %v253_v2 = vpop.permute.xlu1 %252 }
  0x93   :  { %v238_v9 = vpop.permute.xlu0 %237 }
  0x96   :  { %v243_v7 = vpop.permute.xlu1 %242 }
  0x97   :  { %v228_v20 = vpop.permute.xlu0 %227 }
  0x9a   :  { %v233_v14 = vpop.permute.xlu1 %232 }
  0xc6   :  { %v469_v26 = vpop.f32.mrf.mxu0 }
  0xc7   :  { %v165_v46 = vadd.f32 %v469_v26, %v58_v40  ;;  %v223_v26 = vpop.permute.xlu1 %222 }
  0xc8   :  { %v156_v28 = vpop.f32.mrf.mxu0 }
  0xc9   :  { %v189_v55 = vmax.f32 %v165_v46, 0.0  ;;  %v157_v56 = vadd.f32 %v156_v28, %v48_v54 }
  0xca   :  { %v470_v29 = vpop.f32.mrf.mxu0 }
  0xcb   :  { %v168_v42 = vadd.f32 %v470_v29, %v63_v36  ;;  %v187_v59 = vmax.f32 %v157_v56, 0.0 }
  0xcc   :  { %v159_v31 = vpop.f32.mrf.mxu0 }
  0xcd   :  { %v190_v51 = vmax.f32 %v168_v42, 0.0  ;;  %v160_v52 = vadd.f32 %v159_v31, %v53_v50 }
  0xce   :  { %v473_v33 = vpop.f32.mrf.mxu0 }
  0xcf   :  { %v181_v35 = vadd.f32 %v473_v33, %v78_v27  ;;  %v204_v57 = vpack.c.bf16 %v190_v51, %v189_v55  ;;  %v188_v58 = vmax.f32 %v160_v52, 0.0 }
  0xd0   :  { %v172_v34 = vpop.f32.mrf.mxu0 }
  0xd1   :  { %v173_v38 = vadd.f32 %v172_v34, %v68_v25  ;;  %v193_v43 = vmax.f32 %v181_v35, 0.0  ;;  %v203_v60 = vpack.c.bf16 %v188_v58, %v187_v59 }
  0xd2   :  { %v474_v37 = vpop.f32.mrf.mxu0 }
  0xd3   :  { %v184_v39 = vadd.f32 %v474_v37, %v83_v32  ;;  %v191_v47 = vmax.f32 %v173_v38, 0.0  ;;  %v361_v37 = vld [vmem:[%s682_s5] sm:$0x3] }
  0xd4   :  { %v175_v41 = vpop.f32.mrf.mxu0 }
  0xd5   :  { %v194_v44 = vmax.f32 %v184_v39, 0.0  ;;  %v176_v45 = vadd.f32 %v175_v41, %v73_v30  ;;  %v218_v30 = vpop.permute.xlu0 %217 }
  0xd7   :  { %v192_v48 = vmax.f32 %v176_v45, 0.0  ;;  %v206_v49 = vpack.c.bf16 %v194_v44, %v193_v43 }
  0xd9   :  { %v205_v53 = vpack.c.bf16 %v192_v48, %v191_v47  ;;  %475 = vmatprep.subr.bf16.mxu1 %v206_v49  ;;  %v370_v38 = vpop.permute.xlu0 %369 }
  0xda   :  { %476 = vmatpush3.bf16.msra.mxu1 %v206_v49 }
  0xdb   :  { %477 = vmatprep.subr.bf16.mxu1 %v205_v53 }
  0xde   :  { %478 = vmatpush3.bf16.msra.mxu1 %v205_v53 }
  0xdf   :  { %479 = vmatprep.subr.bf16.mxu1 %v204_v57 }
  0xe2   :  { %480 = vmatpush3.bf16.msra.mxu1 %v204_v57 }
  0xe3   :  { %481 = vmatprep.subr.bf16.mxu1 %v203_v60 }
  0xe6   :  { %482 = vmatpush3.bf16.msra.mxu1 %v203_v60 }
  0xe9   :  { %484 = vmatmul.mubr.msk.bf16.vlgmr.msra.gmra.mxu1 %vm275_vm2, %v515_v61 }
  0xea   :  { %487 = vmatprep.mubr.msk.bf16.mxu1 %vm275_vm2, %v516_v62 }
  0xf1   :  { %488 = vmatmul.mubr.msk.bf16.gmra.mxu1 %vm275_vm2, %v517_v63 }
 0x1a9   :  { %v485_v1 = vpop.f32.mrf.mxu1 }
 0x1aa   :  { %v331_v24 = vadd.f32 %v485_v1, %v228_v20 }
 0x1ab   :  { %v322_v3 = vpop.f32.mrf.mxu1 }
 0x1ac   :  { %v355_v31 = vmax.f32 %v331_v24, 0.0  ;;  %v323_v32 = vadd.f32 %v322_v3, %v218_v30 }
 0x1ad   :  { %v486_v5 = vpop.f32.mrf.mxu1 }
 0x1ae   :  { %v334_v21 = vadd.f32 %v486_v5, %v233_v14  ;;  %v353_v35 = vmax.f32 %v323_v32, 0.0 }
 0x1af   :  { %v325_v6 = vpop.f32.mrf.mxu1 }
 0x1b0   :  { %v356_v27 = vmax.f32 %v334_v21, 0.0  ;;  %v326_v28 = vadd.f32 %v325_v6, %v223_v26 }
 0x1b1   :  { %v489_v8 = vpop.f32.mrf.mxu1 }
 0x1b2   :  { %v347_v11 = vadd.f32 %v489_v8, %v248_v4  ;;  %v363_v33 = vpack.c.bf16 %v356_v27, %v355_v31  ;;  %v354_v34 = vmax.f32 %v326_v28, 0.0 }
 0x1b3   :  { %v338_v10 = vpop.f32.mrf.mxu1 }
 0x1b4   :  { %v359_v16 = vmax.f32 %v347_v11, 0.0  ;;  %v339_v17 = vadd.f32 %v338_v10, %v238_v9  ;;  %v362_v36 = vpack.c.bf16 %v354_v34, %v353_v35 }
 0x1b5   :  { %v490_v12 = vpop.f32.mrf.mxu1 }
 0x1b6   :  { %v350_v13 = vadd.f32 %v490_v12, %v253_v2  ;;  %v357_v25 = vmax.f32 %v339_v17, 0.0 }
 0x1b7   :  { %v341_v15 = vpop.f32.mrf.mxu1 }
 0x1b8   :  { %v360_v18 = vmax.f32 %v350_v13, 0.0  ;;  %v342_v19 = vadd.f32 %v341_v15, %v243_v7 }
 0x1ba   :  { %v365_v22 = vpack.c.bf16 %v360_v18, %v359_v16  ;;  %v358_v23 = vmax.f32 %v342_v19, 0.0 }
 0x1bc   :  { %492 = vmatpush3.bf16.msra.mxu0 %v365_v22  ;;  %v364_v29 = vpack.c.bf16 %v358_v23, %v357_v25 }
 0x1bd   :  { %493 = vmatprep.subr.bf16.mxu0 %v541_v0 }
 0x1c0   :  { %494 = vmatpush3.bf16.msra.mxu0 %v364_v29 }
 0x1c1   :  { %495 = vmatprep.subr.bf16.mxu0 %v541_v0 }
 0x1c4   :  { %496 = vmatpush3.bf16.msra.mxu0 %v363_v33 }
 0x1c5   :  { %497 = vmatprep.subr.bf16.mxu0 %v541_v0 }
 0x1c8   :  { %498 = vmatpush3.bf16.msra.mxu0 %v362_v36 }
 0x1cb   :  { %500 = vmatmul.mubr.msk.bf16.vlgmr.msra.gmra.mxu0 %vm275_vm2, %v361_v37 }
 0x28b   :  { %v409_v39 = vpop.f32.mrf.mxu0 }
 0x28c   :  { %v410_v40 = vadd.f32 %v409_v39, %v370_v38 }
 0x28d   :  { %v501_v41 = vpop.f32.mrf.mxu0 }
 0x28e   :  { %415 = vst [vmem:[#allocation2] sm:$0xf] %v410_v40 }
 0x28f   :  { %v412_v42 = vpop.f32.mrf.mxu0 }
 0x290   :  { %529 = shalt.err (!%p526_p4)
}
 0x291   :  { %425 = dma.vmem_to_hbm [thread:$0]  %s423_s25, 64, %s684_s7, [#allocation3]   ;;  %v502_v43 = vpop.f32.mrf.mxu0 }
 0x292   :  { %538 = dma.done.wait [#allocation3], 64  }
 0x293   :  { %539 = vsyncadd [#allocation3], 4294967232 }
 0x294   :  { %429 = vsyncpa [#allocation3], 1 }

</bundles_post_ra>
